<compile_context>
chip_gen: v7x
topology: tpu7x:2x2x1
jax: 0.10.0
libtpu: 0.0.40
codegen_flags: <defaults>
</compile_context>

<pallas_src>
import functools

import jax
import jax.numpy as jnp
from jax.experimental import pallas as pl
from jax.experimental.pallas import tpu as pltpu


def _attn_concat_head_kernel(
    var_kv_ref,    # (TB*S, E2)  "var" half of concat(x), flattened batch*seq
    ref_kv_ref,    # (TB*S, E2)  "ref" half of concat(x)
    var0_ref,      # (TB, E2)    token-0 rows of the var half (query path)
    ref0_ref,      # (TB, E2)    token-0 rows of the ref half
    w_kv_var_ref,  # (E2, 2E)    fused k|v in-proj rows hit by var
    w_kv_ref_ref,  # (E2, 2E)    fused k|v in-proj rows hit by ref
    b_kv_ref,      # (1, 2E)
    w_q_var_ref,   # (E2, E)     q in-proj rows hit by var (1/sqrt(E) folded in)
    w_q_ref_ref,   # (E2, E)     q in-proj rows hit by ref (1/sqrt(E) folded in)
    b_q_ref,       # (1, E)      q bias (pre-scaled)
    wo_ref,        # (E, E)      MHA output projection (transposed)
    bo_ref,        # (1, E)
    wh_ref,        # (E, Lp)     classification head (transposed, zero-padded)
    bh_ref,        # (1, Lp)
    o_ref,         # (TB, Lp)    lane-dense output block
):
    TBS, _ = var_kv_ref.shape
    TB = var0_ref.shape[0]
    S = TBS // TB
    E = wo_ref.shape[0]

    # q projection for token 0 only (scale already folded into weights/bias).
    q = (jnp.dot(var0_ref[...], w_q_var_ref[...], preferred_element_type=jnp.float32)
         + jnp.dot(ref0_ref[...], w_q_ref_ref[...], preferred_element_type=jnp.float32)
         + b_q_ref[...])                                       # (TB, E)

    # Fused k|v projection for the whole batch tile: one tall matmul per input
    # half. concat([var, ref]) @ W == var @ W_top + ref @ W_bot, so no
    # concatenated tensor is ever materialized.
    kv = (jnp.dot(var_kv_ref[...], w_kv_var_ref[...], preferred_element_type=jnp.float32)
          + jnp.dot(ref_kv_ref[...], w_kv_ref_ref[...], preferred_element_type=jnp.float32)
          + b_kv_ref[...])                                     # (TB*S, 2E)
    # In-register reshape of the projected intermediate (layout-free when
    # S % 8 == 0, which holds for S=8); the input refs themselves stay 2D.
    kv = kv.reshape(TB, S, 2 * E)
    k = kv[:, :, :E]                                           # (TB, S, E)
    v = kv[:, :, E:]                                           # (TB, S, E)

    # Token-0 attention via VPU broadcast-mul + reduce (avoids TB independent
    # tiny (1xE)@(ExS) MXU round trips at ~0.4% row utilization).
    s = jnp.sum(q[:, None, :] * k, axis=-1)                    # (TB, S)
    s = s - jnp.max(s, axis=-1, keepdims=True)
    p = jnp.exp(s)
    p = p * pl.reciprocal(jnp.sum(p, axis=-1, keepdims=True), approx=True)
    ctx = jnp.sum(p[:, :, None] * v, axis=1)                   # (TB, E)

    # MHA output projection, tanh, classification head (lane-dense Lp cols).
    h = jnp.tanh(jnp.dot(ctx, wo_ref[...], preferred_element_type=jnp.float32)
                 + bo_ref[...])                                # (TB, E)
    logits = jnp.dot(h, wh_ref[...], preferred_element_type=jnp.float32) + bh_ref[...]
    o_ref[...] = logits.astype(o_ref.dtype)                    # (TB, Lp)


def _vmem_budget_bytes():
    """Half of physical VMEM (v7x: 64 MiB physical; v5e/v6e: 128 MiB)."""
    try:
        cap = int(pltpu.get_tpu_info().vmem_capacity_bytes)
    except Exception:
        cap = 64 << 20
    return int(max(16 << 20, cap // 2))


def _max_tb_for_budget(budget, S, E2, E, Lp, itemsize=4):
    """Largest multiple-of-8 batch tile that keeps the live set inside budget."""
    # Weights/biases (fetched once, but double-buffered by the pipeline).
    w_bytes = 2 * itemsize * (2 * E2 * 2 * E + 2 * E
                              + 2 * E2 * E + E
                              + E * E + E
                              + E * Lp + Lp)
    # Per batch row: double-buffered input/output blocks + f32 intermediates
    # (kv projection, k/v views, q/ctx/h/logits, scores) with slack.
    per_row = itemsize * (2 * (2 * S * E2 + 2 * E2 + Lp)
                          + 2 * S * 2 * E + 6 * E + Lp + 4 * S)
    avail = max(budget - w_bytes, 8 * per_row)
    return int(max(8, (avail // per_row) // 8 * 8))


def _choose_tiling(B, max_tb):
    """Return (TB, Bp): batch rows per grid step and (possibly padded) batch."""
    if B <= max_tb and (B < 16 or B % 8 != 0):
        return B, B        # single step; every block equals the full array dims
    Bp = B if B % 8 == 0 else pl.cdiv(B, 8) * 8   # pad at most 7 rows
    # Aim for >= 2 grid steps (so ("parallel",) can shard across v7x's two
    # TensorCores) with TB a multiple of 8 that divides Bp (no big padding).
    target = min(max_tb, max(8, pl.cdiv(pl.cdiv(Bp, 2), 8) * 8))
    tb = target
    while Bp % tb != 0:
        tb -= 8
    return int(tb), int(Bp)


@functools.partial(jax.jit, static_argnames=("num_labels",))
def attn_concat_head(ref_vector, var_vector, packed, *, num_labels):
    """ref_vector, var_vector: (B, S, E//2) float32. Returns (B, num_labels)."""
    B, S, E2 = ref_vector.shape
    E = 2 * E2
    Lp = packed["bh"].shape[-1]

    budget = _vmem_budget_bytes()
    max_tb = _max_tb_for_budget(budget, S, E2, E, Lp)
    TB, Bp = _choose_tiling(B, max_tb)

    # Wrapper-side layout plumbing (free / tiny XLA ops): flatten the k/v
    # stream to 2D and pull out the token-0 rows for the query path, so the
    # kernel never reshapes or gathers its input refs.
    var_kv = var_vector.reshape(B * S, E2)
    ref_kv = ref_vector.reshape(B * S, E2)
    var0 = var_vector[:, 0, :]
    ref0 = ref_vector[:, 0, :]

    if Bp != B:
        # Only reached for a large batch that is not a multiple of 8
        # (< 8 rows of padding); padded rows compute on zeros and are sliced off.
        var_kv = jnp.pad(var_kv, ((0, (Bp - B) * S), (0, 0)))
        ref_kv = jnp.pad(ref_kv, ((0, (Bp - B) * S), (0, 0)))
        var0 = jnp.pad(var0, ((0, Bp - B), (0, 0)))
        ref0 = jnp.pad(ref0, ((0, Bp - B), (0, 0)))

    kv_spec = pl.BlockSpec((TB * S, E2), lambda b: (b, 0))
    row_spec = pl.BlockSpec((TB, E2), lambda b: (b, 0))
    w_spec = lambda shape: pl.BlockSpec(shape, lambda b: (0,) * len(shape))
    # TODO(synk): weight specs could be single-buffered (pipeline_mode=
    # pl.Buffered(1)) since their index_map is constant; left at the default
    # because their VMEM footprint is negligible at these sizes.
    # TODO(synk): on v6e/v7x, casting inputs/weights to bf16 (f32 accumulation)
    # would halve HBM traffic; kept f32 here to preserve tight validation.

    out = pl.pallas_call(
        _attn_concat_head_kernel,
        out_shape=jax.ShapeDtypeStruct((Bp, Lp), jnp.float32),
        grid_spec=pltpu.PrefetchScalarGridSpec(
            num_scalar_prefetch=0,
            grid=(Bp // TB,),
            in_specs=[
                kv_spec,                 # var_kv
                kv_spec,                 # ref_kv
                row_spec,                # var0
                row_spec,                # ref0
                w_spec((E2, 2 * E)),     # w_kv_var
                w_spec((E2, 2 * E)),     # w_kv_ref
                w_spec((1, 2 * E)),      # b_kv
                w_spec((E2, E)),         # w_q_var
                w_spec((E2, E)),         # w_q_ref
                w_spec((1, E)),          # b_q
                w_spec((E, E)),          # wo
                w_spec((1, E)),          # bo
                w_spec((E, Lp)),         # wh (lane-dense padded)
                w_spec((1, Lp)),         # bh
            ],
            out_specs=pl.BlockSpec((TB, Lp), lambda b: (b, 0)),
        ),
        compiler_params=pltpu.CompilerParams(
            dimension_semantics=("parallel",),
            vmem_limit_bytes=int(budget),
        ),
    )(var_kv, ref_kv, var0, ref0,
      packed["w_kv_var"], packed["w_kv_ref"], packed["b_kv"],
      packed["w_q_var"], packed["w_q_ref"], packed["b_q"],
      packed["wo"], packed["bo"], packed["wh"], packed["bh"])

    return out[:B, :num_labels]


def make_params(key, hidden_dim, num_labels):
    """Deterministic synthetic parameters in PyTorch layout."""
    ks = jax.random.split(key, 6)
    scale = 0.05
    return dict(
        in_proj_w=jax.random.normal(ks[0], (3 * hidden_dim, hidden_dim), jnp.float32) * scale,
        in_proj_b=jax.random.normal(ks[1], (3 * hidden_dim,), jnp.float32) * scale,
        out_proj_w=jax.random.normal(ks[2], (hidden_dim, hidden_dim), jnp.float32) * scale,
        out_proj_b=jax.random.normal(ks[3], (hidden_dim,), jnp.float32) * scale,
        head_w=jax.random.normal(ks[4], (num_labels, hidden_dim), jnp.float32) * scale,
        head_b=jax.random.normal(ks[5], (num_labels,), jnp.float32) * scale,
    )


def pack_params(raw):
    """One-time transform: transpose, split q (token-0 path) from fused k|v,
    fold 1/sqrt(E) into q, split by the var/ref halves of the concatenated
    input, and zero-pad the head to a lane-dense 128-wide output."""
    E = raw["out_proj_w"].shape[0]
    E2 = E // 2
    L = raw["head_w"].shape[0]
    Lp = pl.cdiv(L, 128) * 128

    wq, wk, wv = jnp.split(raw["in_proj_w"], 3, axis=0)   # each (E, E), torch layout
    bq, bk, bv = jnp.split(raw["in_proj_b"], 3)
    scale = 1.0 / jnp.sqrt(jnp.float32(E))                # single head -> head_dim == E

    w_q = wq.T * scale                                     # (E, E)
    w_kv = jnp.concatenate([wk.T, wv.T], axis=1)           # (E, 2E)

    wh = jnp.zeros((E, Lp), jnp.float32).at[:, :L].set(raw["head_w"].T)
    bh = jnp.zeros((1, Lp), jnp.float32).at[:, :L].set(raw["head_b"][None, :])

    return dict(
        w_q_var=w_q[:E2], w_q_ref=w_q[E2:], b_q=(bq * scale)[None, :],
        w_kv_var=w_kv[:E2], w_kv_ref=w_kv[E2:],
        b_kv=jnp.concatenate([bk, bv])[None, :],
        wo=raw["out_proj_w"].T, bo=raw["out_proj_b"][None, :],
        wh=wh, bh=bh,
    )


def reference_jax(ref_vector, var_vector, raw):
    """Plain-JAX replica of the PyTorch forward (eval mode) for validation."""
    x = jnp.concatenate([var_vector, ref_vector], axis=-1)   # (B, S, E)
    E = x.shape[-1]
    wq, wk, wv = jnp.split(raw["in_proj_w"], 3, axis=0)
    bq, bk, bv = jnp.split(raw["in_proj_b"], 3)
    q = x @ wq.T + bq
    k = x @ wk.T + bk
    v = x @ wv.T + bv
    s = jnp.einsum("bqe,bke->bqk", q, k) / jnp.sqrt(jnp.float32(E))
    p = jax.nn.softmax(s, axis=-1)
    ctx = jnp.einsum("bqk,bke->bqe", p, v)
    attn_out = ctx @ raw["out_proj_w"].T + raw["out_proj_b"]
    h = jnp.tanh(attn_out[:, 0, :])                          # dropout = identity (eval)
    return h @ raw["head_w"].T + raw["head_b"]


if __name__ == "__main__":
    B, S = 2, 8
    hidden_embedding_dim = 32        # E (ref/var each carry E//2 = 16 features)
    num_labels = 3

    key = jax.random.PRNGKey(0)
    k_ref, k_var, k_par = jax.random.split(key, 3)
    ref_vec = jax.random.normal(k_ref, (B, S, hidden_embedding_dim // 2), jnp.float32)
    var_vec = jax.random.normal(k_var, (B, S, hidden_embedding_dim // 2), jnp.float32)
    raw_params = make_params(k_par, hidden_embedding_dim, num_labels)
    packed_params = pack_params(raw_params)

    # TODO(synk): dropout is implemented as identity (inference/eval semantics);
    # stochastic training-mode dropout is not reproduced.

    out = attn_concat_head(ref_vec, var_vec, packed_params, num_labels=num_labels)
    out = jax.block_until_ready(out)

    expected = reference_jax(ref_vec, var_vec, raw_params)
    assert out.shape == (B, num_labels), out.shape
    # Tolerance slightly looser than strict f32 because the softmax denominator
    # uses the EUP approximate reciprocal.
    assert jnp.allclose(out, expected, rtol=1e-3, atol=1e-3), (out, expected)

    print("KERNEL_OK")
</pallas_src>

<mosaic_0001>
module attributes {stable_mosaic.version = 11 : i64} {
  func.func @_attn_concat_head_kernel(%arg0: i32, %arg1: memref<16x16xf32, #tpu.memory_space<vmem>>, %arg2: memref<16x16xf32, #tpu.memory_space<vmem>>, %arg3: memref<2x16xf32, #tpu.memory_space<vmem>>, %arg4: memref<2x16xf32, #tpu.memory_space<vmem>>, %arg5: memref<16x64xf32, #tpu.memory_space<vmem>>, %arg6: memref<16x64xf32, #tpu.memory_space<vmem>>, %arg7: memref<1x64xf32, #tpu.memory_space<vmem>>, %arg8: memref<16x32xf32, #tpu.memory_space<vmem>>, %arg9: memref<16x32xf32, #tpu.memory_space<vmem>>, %arg10: memref<1x32xf32, #tpu.memory_space<vmem>>, %arg11: memref<32x32xf32, #tpu.memory_space<vmem>>, %arg12: memref<1x32xf32, #tpu.memory_space<vmem>>, %arg13: memref<32x128xf32, #tpu.memory_space<vmem>>, %arg14: memref<1x128xf32, #tpu.memory_space<vmem>>, %arg15: memref<2x128xf32, #tpu.memory_space<vmem>>) attributes {dimension_semantics = [#tpu.dimension_semantics<parallel>], iteration_bounds = array<i64: 1>, scalar_prefetch = 0 : i64, scratch_operands = 0 : i64, tpu.core_type = #tpu.core_type<tc>, window_params = [{transform_indices = @transform_0, window_bounds = array<i64: 16, 16>}, {transform_indices = @transform_1, window_bounds = array<i64: 16, 16>}, {transform_indices = @transform_2, window_bounds = array<i64: 2, 16>}, {transform_indices = @transform_3, window_bounds = array<i64: 2, 16>}, {pipeline_mode = #tpu.pipeline_mode<synchronous>, transform_indices = @transform_4, window_bounds = array<i64: 16, 64>}, {pipeline_mode = #tpu.pipeline_mode<synchronous>, transform_indices = @transform_5, window_bounds = array<i64: 16, 64>}, {pipeline_mode = #tpu.pipeline_mode<synchronous>, transform_indices = @transform_6, window_bounds = array<i64: 1, 64>}, {pipeline_mode = #tpu.pipeline_mode<synchronous>, transform_indices = @transform_7, window_bounds = array<i64: 16, 32>}, {pipeline_mode = #tpu.pipeline_mode<synchronous>, transform_indices = @transform_8, window_bounds = array<i64: 16, 32>}, {pipeline_mode = #tpu.pipeline_mode<synchronous>, transform_indices = @transform_9, window_bounds = array<i64: 1, 32>}, {pipeline_mode = #tpu.pipeline_mode<synchronous>, transform_indices = @transform_10, window_bounds = array<i64: 32, 32>}, {pipeline_mode = #tpu.pipeline_mode<synchronous>, transform_indices = @transform_11, window_bounds = array<i64: 1, 32>}, {pipeline_mode = #tpu.pipeline_mode<synchronous>, transform_indices = @transform_12, window_bounds = array<i64: 32, 128>}, {pipeline_mode = #tpu.pipeline_mode<synchronous>, transform_indices = @transform_13, window_bounds = array<i64: 1, 128>}, {transform_indices = @transform_14, window_bounds = array<i64: 2, 128>}]} {
    %c0 = arith.constant 0 : index
    %c0_0 = arith.constant 0 : index
    %0 = vector.load %arg3[%c0, %c0_0] : memref<2x16xf32, #tpu.memory_space<vmem>>, vector<2x16xf32>
    %c0_1 = arith.constant 0 : index
    %c0_2 = arith.constant 0 : index
    %1 = vector.load %arg8[%c0_1, %c0_2] : memref<16x32xf32, #tpu.memory_space<vmem>>, vector<16x32xf32>
    %cst = arith.constant dense<0.000000e+00> : vector<2x32xf32>
    %2 = tpu.matmul %0, %1, %cst {dimension_numbers = #tpu.dot_dimension_numbers<[1], [0], [0], [1], [0, 0, 1, 1], [], []>} : vector<2x16xf32>, vector<16x32xf32>, vector<2x32xf32> -> vector<2x32xf32>
    %c0_3 = arith.constant 0 : index
    %c0_4 = arith.constant 0 : index
    %3 = vector.load %arg4[%c0_3, %c0_4] : memref<2x16xf32, #tpu.memory_space<vmem>>, vector<2x16xf32>
    %c0_5 = arith.constant 0 : index
    %c0_6 = arith.constant 0 : index
    %4 = vector.load %arg9[%c0_5, %c0_6] : memref<16x32xf32, #tpu.memory_space<vmem>>, vector<16x32xf32>
    %cst_7 = arith.constant dense<0.000000e+00> : vector<2x32xf32>
    %5 = tpu.matmul %3, %4, %cst_7 {dimension_numbers = #tpu.dot_dimension_numbers<[1], [0], [0], [1], [0, 0, 1, 1], [], []>} : vector<2x16xf32>, vector<16x32xf32>, vector<2x32xf32> -> vector<2x32xf32>
    %6 = arith.addf %2, %5 : vector<2x32xf32>
    %c0_8 = arith.constant 0 : index
    %c0_9 = arith.constant 0 : index
    %7 = vector.load %arg10[%c0_8, %c0_9] : memref<1x32xf32, #tpu.memory_space<vmem>>, vector<1x32xf32>
    %8 = vector.broadcast %7 : vector<1x32xf32> to vector<2x32xf32>
    %9 = arith.addf %6, %8 : vector<2x32xf32>
    %c0_10 = arith.constant 0 : index
    %c0_11 = arith.constant 0 : index
    %10 = vector.load %arg1[%c0_10, %c0_11] : memref<16x16xf32, #tpu.memory_space<vmem>>, vector<16x16xf32>
    %c0_12 = arith.constant 0 : index
    %c0_13 = arith.constant 0 : index
    %11 = vector.load %arg5[%c0_12, %c0_13] : memref<16x64xf32, #tpu.memory_space<vmem>>, vector<16x64xf32>
    %cst_14 = arith.constant dense<0.000000e+00> : vector<16x64xf32>
    %12 = tpu.matmul %10, %11, %cst_14 {dimension_numbers = #tpu.dot_dimension_numbers<[1], [0], [0], [1], [0, 0, 1, 1], [], []>} : vector<16x16xf32>, vector<16x64xf32>, vector<16x64xf32> -> vector<16x64xf32>
    %c0_15 = arith.constant 0 : index
    %c0_16 = arith.constant 0 : index
    %13 = vector.load %arg2[%c0_15, %c0_16] : memref<16x16xf32, #tpu.memory_space<vmem>>, vector<16x16xf32>
    %c0_17 = arith.constant 0 : index
    %c0_18 = arith.constant 0 : index
    %14 = vector.load %arg6[%c0_17, %c0_18] : memref<16x64xf32, #tpu.memory_space<vmem>>, vector<16x64xf32>
    %cst_19 = arith.constant dense<0.000000e+00> : vector<16x64xf32>
    %15 = tpu.matmul %13, %14, %cst_19 {dimension_numbers = #tpu.dot_dimension_numbers<[1], [0], [0], [1], [0, 0, 1, 1], [], []>} : vector<16x16xf32>, vector<16x64xf32>, vector<16x64xf32> -> vector<16x64xf32>
    %16 = arith.addf %12, %15 : vector<16x64xf32>
    %c0_20 = arith.constant 0 : index
    %c0_21 = arith.constant 0 : index
    %17 = vector.load %arg7[%c0_20, %c0_21] : memref<1x64xf32, #tpu.memory_space<vmem>>, vector<1x64xf32>
    %18 = vector.broadcast %17 : vector<1x64xf32> to vector<16x64xf32>
    %19 = arith.addf %16, %18 : vector<16x64xf32>
    %20 = vector.shape_cast %19 : vector<16x64xf32> to vector<2x8x64xf32>
    %21 = vector.extract_strided_slice %20 {offsets = [0, 0, 0], sizes = [2, 8, 32], strides = [1, 1, 1]} : vector<2x8x64xf32> to vector<2x8x32xf32>
    %22 = vector.extract_strided_slice %20 {offsets = [0, 0, 32], sizes = [2, 8, 32], strides = [1, 1, 1]} : vector<2x8x64xf32> to vector<2x8x32xf32>
    %23 = vector.shape_cast %9 : vector<2x32xf32> to vector<2x1x32xf32>
    %24 = vector.broadcast %23 : vector<2x1x32xf32> to vector<2x8x32xf32>
    %25 = arith.mulf %24, %21 : vector<2x8x32xf32>
    %cst_22 = arith.constant dense<0.000000e+00> : vector<2x8xf32>
    %26 = vector.multi_reduction <add>, %25, %cst_22 [2] : vector<2x8x32xf32> to vector<2x8xf32>
    %cst_23 = arith.constant dense<0xFF800000> : vector<2xf32>
    %27 = vector.multi_reduction <maximumf>, %26, %cst_23 [1] : vector<2x8xf32> to vector<2xf32>
    %28 = vector.shape_cast %27 : vector<2xf32> to vector<2x1xf32>
    %29 = vector.broadcast %28 : vector<2x1xf32> to vector<2x8xf32>
    %30 = arith.subf %26, %29 : vector<2x8xf32>
    %31 = math.exp %30 : vector<2x8xf32>
    %cst_24 = arith.constant dense<0.000000e+00> : vector<2xf32>
    %32 = vector.multi_reduction <add>, %31, %cst_24 [1] : vector<2x8xf32> to vector<2xf32>
    %33 = vector.shape_cast %32 : vector<2xf32> to vector<2x1xf32>
    %34 = tpu.reciprocal %33 {approx = true} : vector<2x1xf32> -> vector<2x1xf32>
    %35 = vector.broadcast %34 : vector<2x1xf32> to vector<2x8xf32>
    %36 = arith.mulf %31, %35 : vector<2x8xf32>
    %37 = vector.shape_cast %36 : vector<2x8xf32> to vector<2x8x1xf32>
    %38 = vector.broadcast %37 : vector<2x8x1xf32> to vector<2x8x32xf32>
    %39 = arith.mulf %38, %22 : vector<2x8x32xf32>
    %cst_25 = arith.constant dense<0.000000e+00> : vector<2x32xf32>
    %40 = vector.multi_reduction <add>, %39, %cst_25 [1] : vector<2x8x32xf32> to vector<2x32xf32>
    %c0_26 = arith.constant 0 : index
    %c0_27 = arith.constant 0 : index
    %41 = vector.load %arg11[%c0_26, %c0_27] : memref<32x32xf32, #tpu.memory_space<vmem>>, vector<32x32xf32>
    %cst_28 = arith.constant dense<0.000000e+00> : vector<2x32xf32>
    %42 = tpu.matmul %40, %41, %cst_28 {dimension_numbers = #tpu.dot_dimension_numbers<[1], [0], [0], [1], [0, 0, 1, 1], [], []>} : vector<2x32xf32>, vector<32x32xf32>, vector<2x32xf32> -> vector<2x32xf32>
    %c0_29 = arith.constant 0 : index
    %c0_30 = arith.constant 0 : index
    %43 = vector.load %arg12[%c0_29, %c0_30] : memref<1x32xf32, #tpu.memory_space<vmem>>, vector<1x32xf32>
    %44 = vector.broadcast %43 : vector<1x32xf32> to vector<2x32xf32>
    %45 = arith.addf %42, %44 : vector<2x32xf32>
    %46 = math.tanh %45 : vector<2x32xf32>
    %c0_31 = arith.constant 0 : index
    %c0_32 = arith.constant 0 : index
    %47 = vector.load %arg13[%c0_31, %c0_32] : memref<32x128xf32, #tpu.memory_space<vmem>>, vector<32x128xf32>
    %cst_33 = arith.constant dense<0.000000e+00> : vector<2x128xf32>
    %48 = tpu.matmul %46, %47, %cst_33 {dimension_numbers = #tpu.dot_dimension_numbers<[1], [0], [0], [1], [0, 0, 1, 1], [], []>} : vector<2x32xf32>, vector<32x128xf32>, vector<2x128xf32> -> vector<2x128xf32>
    %c0_34 = arith.constant 0 : index
    %c0_35 = arith.constant 0 : index
    %49 = vector.load %arg14[%c0_34, %c0_35] : memref<1x128xf32, #tpu.memory_space<vmem>>, vector<1x128xf32>
    %50 = vector.broadcast %49 : vector<1x128xf32> to vector<2x128xf32>
    %51 = arith.addf %48, %50 : vector<2x128xf32>
    %c0_36 = arith.constant 0 : index
    %c0_37 = arith.constant 0 : index
    %52 = vector.load %arg15[%c0_36, %c0_37] : memref<2x128xf32, #tpu.memory_space<vmem>>, vector<2x128xf32>
    tpu.vector_store %arg15[%c0_36, %c0_37], %51 {strides = array<i32>} : memref<2x128xf32, #tpu.memory_space<vmem>>, vector<2x128xf32>,
    return
  }
  func.func @transform_0(%arg0: i32) -> (i32, i32) {
    %c0_i32 = arith.constant 0 : i32
    %c0_i32_0 = arith.constant 0 : i32
    return %arg0, %c0_i32 : i32, i32
  }
  func.func @transform_1(%arg0: i32) -> (i32, i32) {
    %c0_i32 = arith.constant 0 : i32
    %c0_i32_0 = arith.constant 0 : i32
    return %arg0, %c0_i32 : i32, i32
  }
  func.func @transform_2(%arg0: i32) -> (i32, i32) {
    %c0_i32 = arith.constant 0 : i32
    %c0_i32_0 = arith.constant 0 : i32
    return %arg0, %c0_i32 : i32, i32
  }
  func.func @transform_3(%arg0: i32) -> (i32, i32) {
    %c0_i32 = arith.constant 0 : i32
    %c0_i32_0 = arith.constant 0 : i32
    return %arg0, %c0_i32 : i32, i32
  }
  func.func @transform_4(%arg0: i32) -> (i32, i32) {
    %c0_i32 = arith.constant 0 : i32
    %c0_i32_0 = arith.constant 0 : i32
    %c0_i32_1 = arith.constant 0 : i32
    return %c0_i32, %c0_i32_0 : i32, i32
  }
  func.func @transform_5(%arg0: i32) -> (i32, i32) {
    %c0_i32 = arith.constant 0 : i32
    %c0_i32_0 = arith.constant 0 : i32
    %c0_i32_1 = arith.constant 0 : i32
    return %c0_i32, %c0_i32_0 : i32, i32
  }
  func.func @transform_6(%arg0: i32) -> (i32, i32) {
    %c0_i32 = arith.constant 0 : i32
    %c0_i32_0 = arith.constant 0 : i32
    %c0_i32_1 = arith.constant 0 : i32
    return %c0_i32, %c0_i32_0 : i32, i32
  }
  func.func @transform_7(%arg0: i32) -> (i32, i32) {
    %c0_i32 = arith.constant 0 : i32
    %c0_i32_0 = arith.constant 0 : i32
    %c0_i32_1 = arith.constant 0 : i32
    return %c0_i32, %c0_i32_0 : i32, i32
  }
  func.func @transform_8(%arg0: i32) -> (i32, i32) {
    %c0_i32 = arith.constant 0 : i32
    %c0_i32_0 = arith.constant 0 : i32
    %c0_i32_1 = arith.constant 0 : i32
    return %c0_i32, %c0_i32_0 : i32, i32
  }
  func.func @transform_9(%arg0: i32) -> (i32, i32) {
    %c0_i32 = arith.constant 0 : i32
    %c0_i32_0 = arith.constant 0 : i32
    %c0_i32_1 = arith.constant 0 : i32
    return %c0_i32, %c0_i32_0 : i32, i32
  }
  func.func @transform_10(%arg0: i32) -> (i32, i32) {
    %c0_i32 = arith.constant 0 : i32
    %c0_i32_0 = arith.constant 0 : i32
    %c0_i32_1 = arith.constant 0 : i32
    return %c0_i32, %c0_i32_0 : i32, i32
  }
  func.func @transform_11(%arg0: i32) -> (i32, i32) {
    %c0_i32 = arith.constant 0 : i32
    %c0_i32_0 = arith.constant 0 : i32
    %c0_i32_1 = arith.constant 0 : i32
    return %c0_i32, %c0_i32_0 : i32, i32
  }
  func.func @transform_12(%arg0: i32) -> (i32, i32) {
    %c0_i32 = arith.constant 0 : i32
    %c0_i32_0 = arith.constant 0 : i32
    %c0_i32_1 = arith.constant 0 : i32
    return %c0_i32, %c0_i32_0 : i32, i32
  }
  func.func @transform_13(%arg0: i32) -> (i32, i32) {
    %c0_i32 = arith.constant 0 : i32
    %c0_i32_0 = arith.constant 0 : i32
    %c0_i32_1 = arith.constant 0 : i32
    return %c0_i32, %c0_i32_0 : i32, i32
  }
  func.func @transform_14(%arg0: i32) -> (i32, i32) {
    %c0_i32 = arith.constant 0 : i32
    %c0_i32_0 = arith.constant 0 : i32
    return %arg0, %c0_i32 : i32, i32
  }
}

</mosaic_0001>

<bundles_post_ra>
// kernel: attn_concat_head.1
= control target key start
LH: loop header
LB: loop body
LE: loop exit
PB: predicated region body
PF: predicated region fallthrough
CT: control target
= control target key end

     0   :  { %19 = vsyncpa [#allocation3], 0  ;;  %s1393_s0 = inlined_call_operand.vmem [shape: f32[16,16], index: 0, kind: input, shape index: {}]   ;;  %s1394_s1 = inlined_call_operand.hbm [shape: f32[16,16], index: 1, kind: input, shape index: {}]   ;;  %s1395_s2 = inlined_call_operand.vmem [shape: f32[2,16], index: 2, kind: input, shape index: {}]   ;;  %s1396_s3 = inlined_call_operand.vmem [shape: f32[2,16], index: 3, kind: input, shape index: {}]   ;;  %s1397_s4 = inlined_call_operand.hbm [shape: f32[16,64], index: 4, kind: input, shape index: {}]   ;;  %s1398_s5 = inlined_call_operand.hbm [shape: f32[16,64], index: 5, kind: input, shape index: {}]   ;;  %s1399_s6 = inlined_call_operand.vmem [shape: f32[1,64], index: 6, kind: input, shape index: {}]   ;;  %s1400_s7 = inlined_call_operand.hbm [shape: f32[16,32], index: 7, kind: input, shape index: {}]   ;;  %s1401_s8 = inlined_call_operand.hbm [shape: f32[16,32], index: 8, kind: input, shape index: {}]   ;;  %s1402_s9 = inlined_call_operand.vmem [shape: f32[1,32], index: 9, kind: input, shape index: {}]   ;;  %s1403_s10 = inlined_call_operand.vmem [shape: f32[32,32], index: 10, kind: input, shape index: {}]   ;;  %s1404_s11 = inlined_call_operand.vmem [shape: f32[1,32], index: 11, kind: input, shape index: {}]   ;;  %s1405_s12 = inlined_call_operand.hbm [shape: f32[32,128], index: 12, kind: input, shape index: {}]   ;;  %s1406_s13 = inlined_call_operand.vmem [shape: f32[1,128], index: 13, kind: input, shape index: {}]   ;;  %s1407_s14 = inlined_call_operand.hbm [shape: f32[2,128], index: 14, kind: output, shape index: {}]  }
   0x1   :  { %20 = vsyncpa [#allocation6], 0 }
   0x2   :  { %21 = vsyncpa [#allocation9], 0 }
   0x3   :  { %22 = vsyncpa [#allocation12], 0 }
   0x4   :  { %23 = vsyncpa [#allocation4], 0  ;;  %s1105_s29 = smov [#allocation5]   ;;  %s1106_s15 = smov [#allocation8]  }
   0x5   :  { %s47_s30 = sshll.u32 %s1105_s29, 4  ;;  %s73_s16 = sshll.u32 %s1106_s15, 4  ;;  %s48_s30 = int_to_ptr.vmem [resolvable:$true] %s47_s30  ;;  %s1195_s16 = int_to_ptr.vmem [resolvable:$true] %s73_s16 }
   0x6   :  { %s941_s19 = scalar_lea.hbm %s1397_s4, 256 }
   0x7   :  { %p942_p0 = scmp.ne.s32.totalorder %s1397_s4, %s941_s19  ;;  %p945_p1 = scmp.lt.u32.totalorder %s941_s19, %s1397_s4 }
   0x9   :  { %p947_p2 = pnand %p945_p1, %p942_p0 }
   0xb   :  { %950 = shalt.err (!%p947_p2)
}
   0xc   :  { %s951_s24 = scalar_lea.vmem %s48_s30, 256  ;;  %p956_p4 = scmp.lt.s32.totalorder %s48_s30, %s48_s30 }
   0xd   :  { %p952_p3 = scmp.ne.s32.totalorder %s48_s30, %s951_s24  ;;  %p957_p5 = scmp.lt.s32.totalorder %s951_s24, %s951_s24 }
   0xf   :  { %p958_p6 = por %p957_p5, %p956_p4 }
  0x11   :  { %p959_p7 = pnand %p958_p6, %p952_p3 }
  0x13   :  { %962 = shalt.err (!%p959_p7)
}
  0x14   :  { %s1107_s25 = smov 128   ;;  %s1108_s26 = smov 8  }
  0x15   :  { %53 = dma.hbm_to_vmem [thread:$0]  %s1397_s4, 256, %s48_s30, [#allocation6], %s1107_s25, %s1107_s25, %s1108_s26  }
  0x16   :  { %s963_s17 = scalar_lea.hbm %s1400_s7, 256 }
  0x17   :  { %p964_p8 = scmp.ne.s32.totalorder %s1400_s7, %s963_s17  ;;  %p967_p9 = scmp.lt.u32.totalorder %s963_s17, %s1400_s7 }
  0x19   :  { %p969_p10 = pnand %p967_p9, %p964_p8 }
  0x1b   :  { %972 = shalt.err (!%p969_p10)
}
  0x1c   :  { %s973_s22 = scalar_lea.vmem %s1195_s16, 256  ;;  %p978_p12 = scmp.lt.s32.totalorder %s1195_s16, %s1195_s16 }
  0x1d   :  { %p974_p11 = scmp.ne.s32.totalorder %s1195_s16, %s973_s22  ;;  %p979_p13 = scmp.lt.s32.totalorder %s973_s22, %s973_s22 }
  0x1f   :  { %p980_p0 = por %p979_p13, %p978_p12 }
  0x21   :  { %p981_p1 = pnand %p980_p0, %p974_p11 }
  0x23   :  { %984 = shalt.err (!%p981_p1)
}
  0x24   :  { %79 = dma.hbm_to_vmem [thread:$0]  %s1400_s7, 256, %s1195_s16, [#allocation9], %s1107_s25, %s1107_s25, %s1108_s26  }
  0x25   :  { %s1109_s23 = smov [#allocation2]   ;;  %s1110_s27 = smov [#allocation7]  }
  0x26   :  { %s31_s24 = sshll.u32 %s1109_s23, 4  ;;  %s59_s28 = sshll.u32 %s1110_s27, 4  ;;  %s32_s24 = int_to_ptr.vmem [resolvable:$true] %s31_s24  ;;  %s1232_s28 = int_to_ptr.vmem [resolvable:$true] %s59_s28 }
  0x27   :  { %s985_s17 = scalar_lea.hbm %s1394_s1, 256 }
  0x28   :  { %p986_p2 = scmp.ne.s32.totalorder %s1394_s1, %s985_s17  ;;  %p989_p3 = scmp.lt.u32.totalorder %s985_s17, %s1394_s1 }
  0x2a   :  { %p991_p4 = pnand %p989_p3, %p986_p2 }
  0x2c   :  { %994 = shalt.err (!%p991_p4)
}
  0x2d   :  { %s995_s7 = scalar_lea.vmem %s32_s24, 256  ;;  %p1000_p6 = scmp.lt.s32.totalorder %s32_s24, %s32_s24 }
  0x2e   :  { %p996_p5 = scmp.ne.s32.totalorder %s32_s24, %s995_s7  ;;  %p1001_p7 = scmp.lt.s32.totalorder %s995_s7, %s995_s7 }
  0x30   :  { %p1002_p8 = por %p1001_p7, %p1000_p6 }
  0x32   :  { %p1003_p9 = pnand %p1002_p8, %p996_p5 }
  0x34   :  { %1006 = shalt.err (!%p1003_p9)
}
  0x35   :  { %37 = dma.hbm_to_vmem [thread:$0]  %s1394_s1, 256, %s32_s24, [#allocation3], %s1107_s25, %s1107_s25, %s1108_s26  }
  0x36   :  { %s1007_s23 = scalar_lea.hbm %s1398_s5, 256 }
  0x37   :  { %p1008_p10 = scmp.ne.s32.totalorder %s1398_s5, %s1007_s23  ;;  %p1011_p11 = scmp.lt.u32.totalorder %s1007_s23, %s1398_s5 }
  0x39   :  { %p1013_p12 = pnand %p1011_p11, %p1008_p10 }
  0x3b   :  { %1016 = shalt.err (!%p1013_p12)
}
  0x3c   :  { %s1017_s18 = scalar_lea.vmem %s1232_s28, 256  ;;  %p1022_p0 = scmp.lt.s32.totalorder %s1232_s28, %s1232_s28 }
  0x3d   :  { %p1018_p13 = scmp.ne.s32.totalorder %s1232_s28, %s1017_s18  ;;  %p1023_p1 = scmp.lt.s32.totalorder %s1017_s18, %s1017_s18 }
  0x3f   :  { %p1024_p2 = por %p1023_p1, %p1022_p0 }
  0x41   :  { %p1025_p3 = pnand %p1024_p2, %p1018_p13 }
  0x43   :  { %1028 = shalt.err (!%p1025_p3)
}
  0x44   :  { %65 = dma.hbm_to_vmem [thread:$0]  %s1398_s5, 256, %s1232_s28, [#allocation6], %s1107_s25, %s1107_s25, %s1108_s26  }
  0x45   :  { %s1111_s19 = smov [#allocation10]   ;;  %s1112_s21 = smov [#allocation11]  }
  0x46   :  { %s85_s20 = sshll.u32 %s1111_s19, 4  ;;  %s103_s7 = sshll.u32 %s1112_s21, 4  ;;  %s86_s20 = int_to_ptr.vmem [resolvable:$true] %s85_s20  ;;  %s1269_s7 = int_to_ptr.vmem [resolvable:$true] %s103_s7 }
  0x47   :  { %s1029_s4 = scalar_lea.hbm %s1401_s8, 256 }
  0x48   :  { %p1030_p4 = scmp.ne.s32.totalorder %s1401_s8, %s1029_s4  ;;  %p1033_p5 = scmp.lt.u32.totalorder %s1029_s4, %s1401_s8 }
  0x4a   :  { %p1035_p6 = pnand %p1033_p5, %p1030_p4 }
  0x4c   :  { %1038 = shalt.err (!%p1035_p6)
}
  0x4d   :  { %s1039_s5 = scalar_lea.vmem %s86_s20, 256  ;;  %p1044_p8 = scmp.lt.s32.totalorder %s86_s20, %s86_s20 }
  0x4e   :  { %p1040_p7 = scmp.ne.s32.totalorder %s86_s20, %s1039_s5  ;;  %p1045_p9 = scmp.lt.s32.totalorder %s1039_s5, %s1039_s5 }
  0x50   :  { %p1046_p10 = por %p1045_p9, %p1044_p8 }
  0x52   :  { %p1047_p11 = pnand %p1046_p10, %p1040_p7 }
  0x54   :  { %1050 = shalt.err (!%p1047_p11)
}
  0x55   :  { %91 = dma.hbm_to_vmem [thread:$0]  %s1401_s8, 256, %s86_s20, [#allocation9], %s1107_s25, %s1107_s25, %s1108_s26  }
  0x56   :  { %s1051_s1 = scalar_lea.hbm %s1405_s12, 512 }
  0x57   :  { %p1052_p12 = scmp.ne.s32.totalorder %s1405_s12, %s1051_s1  ;;  %p1055_p13 = scmp.lt.u32.totalorder %s1051_s1, %s1405_s12 }
  0x59   :  { %p1057_p0 = pnand %p1055_p13, %p1052_p12 }
  0x5b   :  { %1060 = shalt.err (!%p1057_p0)
}
  0x5c   :  { %s1061_s22 = scalar_lea.vmem %s1269_s7, 512  ;;  %p1066_p2 = scmp.lt.s32.totalorder %s1269_s7, %s1269_s7 }
  0x5d   :  { %p1062_p1 = scmp.ne.s32.totalorder %s1269_s7, %s1061_s22  ;;  %p1067_p3 = scmp.lt.s32.totalorder %s1061_s22, %s1061_s22 }
  0x5f   :  { %p1068_p4 = por %p1067_p3, %p1066_p2 }
  0x61   :  { %p1069_p5 = pnand %p1068_p4, %p1062_p1 }
  0x63   :  { %1072 = shalt.err (!%p1069_p5)
}
  0x64   :  { %109 = dma.hbm_to_vmem [thread:$0]  %s1405_s12, 512, %s1269_s7, [#allocation12], %s1107_s25, %s1107_s25, %s1108_s26  }
  0x65   :  { %1095 = dma.done.wait [#allocation3], 256  }
  0x66   :  { %1096 = vsyncadd [#allocation3], 4294967040 }
  0x67   :  { %1097 = dma.done.wait [#allocation6], 512  }
  0x68   :  { %1098 = vsyncadd [#allocation6], 4294966784 }
  0x69   :  { %1099 = dma.done.wait [#allocation9], 512  }
  0x6a   :  { %1100 = vsyncadd [#allocation9], 4294966784 }
  0x6b   :  { %1101 = dma.done.wait [#allocation12], 512  }
  0x6c   :  { %1102 = vsyncadd [#allocation12], 4294966784  ;;  %v1113_v0 = vmov 0.0|0.0   ;;  %vm1114_vm0 = vmmov 0   ;;  %v1115_v1 = vmov 0.0   ;;  %vm136_vm1 = vcmask 130048  }
  0x6d   :  { %888 = vmatprep.subr.bf16.mxu1 %v1113_v0  ;;  %842 = vmatprep.mubr.msk.f32.mxu1 %vm1114_vm0, %v1115_v1  ;;  %v134_v2 = vld [vmem:[#allocation10] sm:$0xff]  ;;  %v135_v3 = vld [vmem:[#allocation10 + $0x8] sm:$0xff]  ;;  %v131_v9 = vld [vmem:[#allocation8] sm:$0xff]  ;;  %v1116_v20 = vmov 1966171168   ;;  %v474_v22 = vlaneseq  ;;  %vm505_vm2 = vcmask 261120  }
  0x6e   :  { %v297_v4 = vld [vmem:[#allocation7] sm:$0xff]  ;;  %v889_v5 = vpack.c.bf16 %v135_v3, %v134_v2  ;;  %v298_v6 = vld [vmem:[#allocation7 + $0x8] sm:$0xff]  ;;  %v132_v10 = vld [vmem:[#allocation8 + $0x8] sm:$0xff]  ;;  %v472_v21 = vunpack.c.l.s4 %v1116_v20  ;;  %vm524_vm3 = vcmask 1041409   ;;  %vm527_vm4 = vcmask 58368   ;;  %s1119_s22 = smov [#allocation13]  }
  0x6f   :  { %v295_v7 = vld [vmem:[#allocation2] sm:$0xff]  ;;  %v894_v8 = vpack.c.bf16 %v298_v6, %v297_v4  ;;  %v892_v12 = vpack.c.bf16 %v132_v10, %v131_v9  ;;  %v293_v13 = vld [vmem:[#allocation5] sm:$0xff]  ;;  %v294_v14 = vld [vmem:[#allocation5 + $0x8] sm:$0xff]  ;;  %v1332_v26 = vshrl.u32 %v474_v22, 7  ;;  %v515_v49 = vand.u32 127, %v474_v22  ;;  %s790_s8 = sshll.u32 %s1119_s22, 4  ;;  %s791_s8 = int_to_ptr.vmem [resolvable:$true] %s790_s8 }
  0x70   :  { %856 = vmatprep.mubr.msk.f32.mxu0 %vm136_vm1, %v295_v7  ;;  %890 = vmatpush3.bf16.msra.mxu1 %v889_v5  ;;  %v133_v11 = vld [vmem:[%s1396_s3] sm:$0x3]  ;;  %v898_v15 = vpack.c.bf16 %v294_v14, %v293_v13  ;;  %v296_v16 = vld [vmem:[#allocation2 + $0x8] sm:$0xff]  ;;  %v473_v25 = vunpack.c.0.s8 %v472_v21  ;;  %v1117_v57 = vmov 0   ;;  %v613_v21 = vld [vmem:[%s1403_s10 + $0x18] sm:$0xff]  ;;  %vm595_vm5 = vcmask 523520   ;;  %p1078_p7 = scmp.lt.s32.totalorder %s791_s8, %s791_s8 }
  0x71   :  { %895 = vmatprep.subr.bf16.mxu0 %v894_v8  ;;  %891 = vmatprep.subr.bf16.mxu1 %v1113_v0  ;;  %v291_v17 = vld [vmem:[%s1393_s0] sm:$0xff]  ;;  %v292_v19 = vld [vmem:[%s1393_s0 + $0x8] sm:$0xff]  ;;  %v495_v34 = vsub.s32 0, %v1332_v26  ;;  %v518_v51 = vsub.s32 %v515_v49, %v1332_v26  ;;  %v538_v58 = vsub.s32 1, %v1332_v26  ;;  %s1073_s20 = scalar_lea.vmem %s791_s8, 32 }
  0x72   :  { %897 = vmatpush3.bf16.msra.mxu0 %v894_v8  ;;  %v130_v18 = vld [vmem:[%s1395_s2] sm:$0x3]  ;;  %v476_v30 = vsub.s32 %v473_v25, %v1332_v26  ;;  %932 = vset.pattern.permute.xlu0 %v1117_v57  ;;  %p1074_p6 = scmp.ne.s32.totalorder %s791_s8, %s1073_s20  ;;  %p1079_p8 = scmp.lt.s32.totalorder %s1073_s20, %s1073_s20 }
  0x73   :  { %843 = vmatmul.mubr.msk.f32.vlgmr.msra.gmra.mrb[0].mxu1 %vm136_vm1, %v133_v11  ;;  %899 = vmatprep.subr.bf16.mxu0 %v898_v15  ;;  %v804_v28 = vld [vmem:[%s1402_s9] ss:$0 sm:$0xff] }
  0x74   :  { %893 = vmatpush3.bf16.msra.mxu1 %v892_v12  ;;  %849 = vmatprep.mubr.msk.f32.mxu1 %vm1114_vm0, %v1115_v1  ;;  %v809_v36 = vld [vmem:[%s1399_s6] ss:$0 sm:$0xff]  ;;  %p1080_p9 = por %p1079_p8, %p1078_p7 }
  0x75   :  { %857 = vmatmul.mubr.msk.f32.vlgmr.msra.gmra.mrb[0].mxu0 %vm136_vm1, %v296_v16  ;;  %902 = vmatprep.subr.bf16.mxu1 %v1113_v0  ;;  %v810_v49 = vld [vmem:[%s1404_s11] ss:$0 sm:$0xff] }
  0x76   :  { %901 = vmatpush3.bf16.msra.mxu0 %v898_v15  ;;  %863 = vmatprep.mubr.msk.f32.mxu0 %vm136_vm1, %v291_v17  ;;  %v610_v17 = vld [vmem:[%s1403_s10] sm:$0xff]  ;;  %p1081_p10 = pnand %p1080_p9, %p1074_p6 }
  0x77   :  { %850 = vmatmul.mubr.msk.f32.vlgmr.msra.gmra.mrb[2].mxu1 %vm136_vm1, %v130_v18  ;;  %908 = vmatprep.subr.bf16.mxu0 %v1113_v0  ;;  %v611_v18 = vld [vmem:[%s1403_s10 + $0x8] sm:$0xff] }
  0x78   :  { %874 = vmatprep.mubr.msk.f32.mxu1 %vm1114_vm0, %v1115_v1  ;;  %931 = vset.pattern.permute.xlu1 %v1117_v57  ;;  %v903_v20 = vpack.c.bf16 %v611_v18, %v610_v17 }
  0x7a   :  { %904 = vmatpush3.bf16.msra.mxu1 %v903_v20 }
  0x7b   :  { %905 = vmatprep.subr.bf16.mxu1 %v1113_v0 }
  0x7d   :  { %864 = vmatmul.mubr.msk.f32.vlgmr.msra.gmra.mrb[0].mxu0 %vm136_vm1, %v292_v19  ;;  %v612_v19 = vld [vmem:[%s1403_s10 + $0x10] sm:$0xff]  ;;  %s1118_s10 = smov 96  }
  0x7e   :  { %885 = vmatprep.mubr.msk.f32.mxu0 %vm1114_vm0, %v1115_v1  ;;  %v906_v22 = vpack.c.bf16 %v613_v21, %v612_v19 }
  0x80   :  { %907 = vmatpush3.bf16.msra.mxu1 %v906_v22 }
 0x146   :  { %v206_v23 = vpop.f32.mrb[0].mxu1 }
 0x147   :  { %v844_v24 = vpop.f32.mrb[1].mxu1 }
 0x14a   :  { %v279_v27 = vpop.f32.mrb[2].mxu1 }
 0x14b   :  { %v280_v29 = vadd.f32 %v279_v27, %v206_v23  ;;  %v851_v31 = vpop.f32.mrb[3].mxu1 }
 0x14d   :  { %v290_v32 = vadd.f32 %v804_v28, %v280_v29 }
 0x14f   :  { %v477_v33 = vrot.slane %v290_v32, %v476_v30 }
 0x150   :  { %v865_v35 = vpop.f32.mrb[0].mxu0 }
 0x151   :  { %v478_v37 = vcombine.high %v477_v33, %v477_v33  ;;  %v452_v38 = vpop.f32.mrb[1].mxu0  ;;  %v485_v39 = vrot.slane %v477_v33, %v476_v30  ;;  %v1344_v43 = vadd.f32 %v865_v35, %v809_v36 }
 0x152   :  { %v1342_v40 = vadd.f32 %v809_v36, %v452_v38 }
 0x153   :  { %v496_v41 = vrot.slane %v485_v39, %v495_v34  ;;  %v492_v42 = vrot.slane %v478_v37, %v476_v30 }
 0x155   :  { %v503_v44 = vmul.f32 %v496_v41, %v1342_v40  ;;  %v500_v45 = vrot.slane %v492_v42, %v495_v34 }
 0x157   :  { %v506_v46 = vsel %vm505_vm2, %v503_v44, 0.0  ;;  %v504_v47 = vmul.f32 %v500_v45, %v1344_v43  ;;  %v700_v44 = vld [vmem:[#allocation11 + $0x8] sm:$0xff]  ;;  %v701_v45 = vld [vmem:[#allocation11 + $0x10] sm:$0xff] }
 0x158   :  { %507 = vadd.xlane.f32.xlu0 %v506_v46 }
 0x159   :  { %v509_v48 = vsel %vm505_vm2, %v504_v47, 0.0  ;;  %v702_v47 = vld [vmem:[#allocation11 + $0x18] sm:$0xff] }
 0x15c   :  { %510 = vadd.xlane.f32.xlu0 %v509_v48  ;;  %v912_v48 = vpack.c.bf16 %v702_v47, %v701_v45 }
 0x1e5   :  { %v508_v50 = vpop.xlane.xlu0 %507 }
 0x1e6   :  { %v519_v53 = vrot.slane %v508_v50, %v518_v51 }
 0x1e9   :  { %v511_v52 = vpop.xlane.xlu0 %510 }
 0x1ea   :  { %v523_v54 = vrot.slane %v511_v52, %v518_v51 }
 0x1ec   :  { %v525_v55 = vsel %vm524_vm3, %v523_v54, %v519_v53  ;;  %v812_v54 = vld [vmem:[%s1406_s13] ss:$0 sm:$0xff] }
 0x1ed   :  { %v528_v56 = vsel %vm527_vm4, %v525_v55, -inf }
 0x1ee   :  { %529 = vmax.xlane.f32.xlu1 %v528_v56 }
 0x27b   :  { %v530_v59 = vpop.xlane.xlu1 %529 }
 0x27c   :  { %v535_v60 = vrot.slane %v530_v59, %v495_v34  ;;  %v539_v61 = vrot.slane %v530_v59, %v538_v58 }
 0x27e   :  { %v542_v62 = vsub.f32 %v508_v50, %v535_v60  ;;  %v543_v63 = vsub.f32 %v511_v52, %v539_v61 }
 0x280   :  { %v544_v1 = vmul.f32 1.442695, %v542_v62  ;;  %v546_v2 = vmul.f32 1.442695, %v543_v63 }
 0x282   :  { %933 = vpow2.f32 %v544_v1 }
 0x283   :  { %935 = vpow2.f32 %v546_v2 }
 0x28c   :  { %v934_v3 = vpop.eup %933 }
 0x28d   :  { %v936_v4 = vpop.eup %935  ;;  %551 = vperm.xlu1 %931, %v934_v3  }
 0x28e   :  { %554 = vperm.xlu0 %932, %v936_v4  }
 0x30c   :  { %v552_v5 = vpop.permute.xlu1 %551 }
 0x30d   :  { %v555_v6 = vpop.permute.xlu0 %554  ;;  %v559_v7 = vrot.slane %v552_v5, %v518_v51 }
 0x30e   :  { %v563_v8 = vrot.slane %v555_v6, %v518_v51 }
 0x310   :  { %v564_v9 = vsel %vm524_vm3, %v563_v8, %v559_v7 }
 0x311   :  { %v566_v10 = vsel %vm527_vm4, %v564_v9, 0.0 }
 0x312   :  { %567 = vadd.xlane.f32.xlu1 %v566_v10 }
 0x39f   :  { %v568_v11 = vpop.xlane.xlu1 %567 }
 0x3a0   :  { %937 = vrcp.f32 %v568_v11 }
 0x3aa   :  { %v938_v12 = vpop.eup %937 }
 0x3ab   :  { %v574_v13 = vrot.slane %v938_v12, %v495_v34  ;;  %v578_v15 = vrot.slane %v938_v12, %v538_v58 }
 0x3ad   :  { %v581_v14 = vmul.f32 %v934_v3, %v574_v13  ;;  %v582_v16 = vmul.f32 %v936_v4, %v578_v15 }
 0x3af   :  { %585 = vperm.xlu0 %932, %v581_v14  }
 0x3b3   :  { %590 = vperm.xlu0 %932, %v582_v16  }
 0x42e   :  { %v586_v23 = vpop.permute.xlu0 %585 }
 0x42f   :  { %v593_v24 = vmul.f32 %v586_v23, %v1342_v40 }
 0x431   :  { %v596_v25 = vsel %vm595_vm5, %v593_v24, 0.0 }
 0x432   :  { %v597_v26 = vrot.slane %v596_v25, 4  ;;  %v591_v27 = vpop.permute.xlu0 %590 }
 0x433   :  { %v594_v28 = vmul.f32 %v591_v27, %v1344_v43  ;;  %v699_v43 = vld [vmem:[#allocation11] sm:$0xff] }
 0x434   :  { %v598_v29 = vadd.f32 %v597_v26, %v596_v25  ;;  %v909_v46 = vpack.c.bf16 %v700_v44, %v699_v43 }
 0x435   :  { %v603_v30 = vsel %vm595_vm5, %v594_v28, 0.0 }
 0x436   :  { %v599_v31 = vrot.slane %v598_v29, 2  ;;  %v604_v32 = vrot.slane %v603_v30, 4  ;;  %910 = vmatpush3.bf16.msra.mxu0 %v909_v46 }
 0x437   :  { %911 = vmatprep.subr.bf16.mxu0 %v1113_v0 }
 0x438   :  { %v600_v33 = vadd.f32 %v599_v31, %v598_v29  ;;  %v605_v34 = vadd.f32 %v604_v32, %v603_v30 }
 0x43a   :  { %v606_v35 = vrot.slane %v605_v34, 2  ;;  %v601_v36 = vrot.slane %v600_v33, 1  ;;  %913 = vmatpush3.bf16.msra.mxu0 %v912_v48 }
 0x43c   :  { %v607_v37 = vadd.f32 %v606_v35, %v605_v34  ;;  %v602_v39 = vadd.f32 %v601_v36, %v600_v33 }
 0x43e   :  { %v608_v38 = vrot.slane %v607_v37, 1 }
 0x440   :  { %v609_v41 = vadd.f32 %v608_v38, %v607_v37 }
 0x442   :  { %v623_v42 = vsel %vm524_vm3, %v609_v41, %v602_v39 }
 0x443   :  { %624 = vrot.lane.b32.xlu1 %v623_v42, %s1118_s10 }
 0x4b5   :  { %v625_v40 = vpop.permute.xlu1 %624 }
 0x4b6   :  { %875 = vmatmul.mubr.msk.f32.vlgmr.msra.gmra.mrb[4].mxu1 %vm505_vm2, %v625_v40 }
 0x589   :  { %v694_v50 = vpop.f32.mrb[4].mxu1 }
 0x58a   :  { %v695_v51 = vadd.f32 %v810_v49, %v694_v50  ;;  %v876_v52 = vpop.f32.mrb[5].mxu1 }
 0x58c   :  { %939 = vtanh.f32 %v695_v51 }
 0x596   :  { %v940_v53 = vpop.eup %939 }
 0x597   :  { %886 = vmatmul.mubr.msk.f32.vlgmr.msra.gmra.mrb[2].mxu0 %vm505_vm2, %v940_v53 }
 0x66a   :  { %v779_v55 = vpop.f32.mrb[2].mxu0 }
 0x66b   :  { %v780_v0 = vadd.f32 %v812_v54, %v779_v55  ;;  %v887_v56 = vpop.f32.mrb[3].mxu0 }
 0x66d   :  { %783 = vst [vmem:[#allocation13] sm:$0x3] %v780_v0 }
 0x66e   :  { %1084 = shalt.err (!%p1081_p10)
}
 0x66f   :  { %s1085_s25 = scalar_lea.hbm %s1407_s14, 32 }
 0x670   :  { %p1086_p11 = scmp.ne.s32.totalorder %s1407_s14, %s1085_s25  ;;  %p1089_p12 = scmp.lt.u32.totalorder %s1085_s25, %s1407_s14 }
 0x672   :  { %p1091_p13 = pnand %p1089_p12, %p1086_p11 }
 0x674   :  { %1094 = shalt.err (!%p1091_p13)
}
 0x675   :  { %793 = dma.vmem_to_hbm [thread:$0]  %s791_s8, 32, %s1407_s14, [#allocation4]  }
 0x676   :  { %1103 = dma.done.wait [#allocation4], 32  }
 0x677   :  { %1104 = vsyncadd [#allocation4], 4294967264 }
 0x678   :  { %797 = vsyncpa [#allocation3], 1 }
 0x679   :  { %798 = vsyncpa [#allocation6], 1 }
 0x67a   :  { %799 = vsyncpa [#allocation9], 1 }
 0x67b   :  { %800 = vsyncpa [#allocation12], 1 }
 0x67c   :  { %801 = vsyncpa [#allocation4], 1 }

</bundles_post_ra>
